<compile_context>
chip_gen: v7x
topology: tpu7x:2x2x1
jax: 0.10.0
libtpu: 0.0.40
codegen_flags: <defaults>
</compile_context>

<pallas_src>
import functools

import jax
import jax.numpy as jnp
from jax.experimental import pallas as pl
from jax.experimental.pallas import tpu as pltpu


def _ceil_div(a, b):
    return -(-a // b)


def _default_num_tiles():
    """2 grid steps on dual-TensorCore v7x, 1 on single-TC v5e/v6e."""
    try:
        kind = jax.devices()[0].device_kind.lower()
    except Exception:
        return 1
    return 2 if ("v7" in kind or "7x" in kind) else 1


def _self_attention_kernel(mask_ref, x_ref, w1_ref, w2_ref, expand_ref, tile_ref,
                           xrep_ref, alphas_ref, *, matmul_dtype):
    """One grid step processes a tile of bt whole sequences."""
    bt, l, i_dim = x_ref.shape
    r_dim = w2_ref.shape[1]
    ri = r_dim * i_dim
    f32 = jnp.float32

    # Flatten the batch tile to a (bt*l, i_dim) slab so both projection
    # matmuls run once per tile with a real M dimension.  l is a multiple of
    # 8, so the reshape is a pure sublane relabel.
    x = x_ref[...]                                     # (bt, l, i) f32
    x_flat = x.reshape(bt * l, i_dim)
    x_mm = x_flat.astype(matmul_dtype)

    h = jnp.tanh(jnp.dot(x_mm, w1_ref[...],
                         preferred_element_type=f32))              # (bt*l, d) f32
    a = jnp.dot(h.astype(matmul_dtype), w2_ref[...],
                preferred_element_type=f32)                         # (bt*l, r) f32

    # Masked softmax over the sequence axis, kept in (l, r) layout (no
    # pre-softmax transpose).  mask_ref holds precomputed 0 / -1e30 values.
    scores = a.reshape(bt, l, r_dim) + mask_ref[...]   # (bt, l, r) + (bt, l, 1)
    m = jnp.max(scores, axis=1, keepdims=True)         # (bt, 1, r)
    e = jnp.exp(scores - m)
    s = jnp.sum(e, axis=1, keepdims=True)              # (bt, 1, r)
    p = e * pl.reciprocal(s, approx=False)             # exact normalization

    # alphas stored in (bt, l, r) layout: single contiguous store; the
    # wrapper transposes the tiny result to the module's (b, r, l) layout.
    alphas_ref[...] = p

    # Lane-dense x_rep:  x_rep[b, r*i_dim + i] = sum_l p[b,l,r] * x[b,l,i]
    #   expand (r, r*i): repeats each attention prob i_dim times along lanes,
    #   tile   (i, r*i): repeats the feature vector r_dim times along lanes,
    # both precomputed in the wrapper (VMEM-resident constants).  The final
    # per-sequence reduction is a reshape (sublane relabel) + sum over l.
    p_mm = p.reshape(bt * l, r_dim).astype(matmul_dtype)
    p_exp = jnp.dot(p_mm, expand_ref[...], preferred_element_type=f32)  # (bt*l, r*i)
    x_til = jnp.dot(x_mm, tile_ref[...], preferred_element_type=f32)    # (bt*l, r*i)
    xrep_ref[...] = (p_exp * x_til).reshape(bt, l, ri).sum(axis=1)      # (bt, r*i)


@functools.partial(jax.jit, static_argnums=(4, 5))
def _self_attention_impl(x, batch_lengths, w1, w2, num_tiles, matmul_dtype):
    b, l, i_dim = x.shape
    d_dim = w1.shape[1]
    r_dim = w2.shape[1]
    ri = r_dim * i_dim
    f32 = jnp.float32

    # Tile the batch into `num_tiles` equal tiles of bt sequences each, with
    # bt a multiple of 8 (sublane alignment for the (bt, 128) x_rep block).
    # Pad the batch instead of shrinking the tile.
    num_tiles = max(1, min(int(num_tiles), _ceil_div(b, 8)))
    bt = _ceil_div(_ceil_div(b, num_tiles), 8) * 8
    b_pad = bt * num_tiles

    lens = batch_lengths.astype(jnp.int32)
    if b_pad != b:
        x = jnp.pad(x, ((0, b_pad - b), (0, 0), (0, 0)))
        lens = jnp.pad(lens, (0, b_pad - b))           # padded rows -> len 0 (fully masked)

    # Precomputed additive mask (hoists per-step iota/cmp/select out of the kernel).
    pos = jnp.arange(l, dtype=jnp.int32)
    add_mask = jnp.where(pos[None, :] < lens[:, None], 0.0, -1e30).astype(f32)
    add_mask = add_mask[:, :, None]                    # (b_pad, l, 1)

    # One-hot selector constants for the lane-dense x_rep epilogue.
    col = jax.lax.broadcasted_iota(jnp.int32, (r_dim, ri), 1)
    row = jax.lax.broadcasted_iota(jnp.int32, (r_dim, ri), 0)
    expand = (col // i_dim == row).astype(matmul_dtype)          # (r, r*i)
    col = jax.lax.broadcasted_iota(jnp.int32, (i_dim, ri), 1)
    row = jax.lax.broadcasted_iota(jnp.int32, (i_dim, ri), 0)
    tile = (col % i_dim == row).astype(matmul_dtype)             # (i, r*i)

    w1c = w1.astype(matmul_dtype)
    w2c = w2.astype(matmul_dtype)

    x_rep, alphas_lr = pl.pallas_call(
        functools.partial(_self_attention_kernel, matmul_dtype=matmul_dtype),
        grid=(num_tiles,),
        in_specs=[
            pl.BlockSpec((bt, l, 1), lambda i: (i, 0, 0)),        # additive mask
            pl.BlockSpec((bt, l, i_dim), lambda i: (i, 0, 0)),    # x tile
            pl.BlockSpec((i_dim, d_dim), lambda i: (0, 0)),       # w1 (VMEM-resident)
            pl.BlockSpec((d_dim, r_dim), lambda i: (0, 0)),       # w2 (VMEM-resident)
            pl.BlockSpec((r_dim, ri), lambda i: (0, 0)),          # expand (resident const)
            pl.BlockSpec((i_dim, ri), lambda i: (0, 0)),          # tile   (resident const)
        ],
        out_specs=[
            pl.BlockSpec((bt, ri), lambda i: (i, 0)),             # x_rep, lane-dense (…,128)
            pl.BlockSpec((bt, l, r_dim), lambda i: (i, 0, 0)),    # alphas in (l, r) layout
        ],
        out_shape=(
            jax.ShapeDtypeStruct((b_pad, ri), f32),
            jax.ShapeDtypeStruct((b_pad, l, r_dim), f32),
        ),
        compiler_params=pltpu.CompilerParams(
            dimension_semantics=("parallel",)),        # shards grid steps across v7x cores
    )(add_mask, x, w1c, w2c, expand, tile)

    alphas = jnp.transpose(alphas_lr, (0, 2, 1))       # (b_pad, r, l) -- ~2 KiB, free in XLA
    if b_pad != b:
        x_rep = x_rep[:b]
        alphas = alphas[:b]
    return x_rep, alphas


def self_attention(x, batch_lengths, w1, w2, *, num_tiles=None,
                   matmul_dtype=jnp.bfloat16):
    """x: (b, l, i_dim) f32, batch_lengths: (b,) int, w1: (i_dim, d_dim),
       w2: (d_dim, r_dim) (weights stored transposed w.r.t. nn.Linear).
       Returns (x_rep (b, r_dim*i_dim), alphas (b, r_dim, l)).
       matmul_dtype=jnp.float32 gives bit-accurate matmuls; the default
       bfloat16 feeds the MXU native-precision operands (f32 accumulate)."""
    if num_tiles is None:
        num_tiles = _default_num_tiles()
    return _self_attention_impl(x, batch_lengths, w1, w2, int(num_tiles), matmul_dtype)


def _reference(x, batch_lengths, w1, w2):
    b, l, i_dim = x.shape
    h = jnp.tanh(x @ w1)                       # (b, l, d)
    a = h @ w2                                 # (b, l, r)
    scores = jnp.transpose(a, (0, 2, 1))       # (b, r, l)
    pos = jnp.arange(l)[None, None, :]
    mask = pos < batch_lengths[:, None, None]
    scores = jnp.where(mask, scores, -jnp.inf)
    alphas = jax.nn.softmax(scores, axis=2)
    x_rep = jnp.einsum("brl,bli->bri", alphas, x)
    return x_rep.reshape(b, -1), alphas


if __name__ == "__main__":
    # Module hyperparameters (from SelfAttention.__init__).
    i_dim, d_dim, r_dim = 32, 16, 4
    b, l = 16, 8

    key = jax.random.PRNGKey(0)
    kx, k1, k2, kl = jax.random.split(key, 4)

    x = jax.random.normal(kx, (b, l, i_dim), dtype=jnp.float32)
    # nn.Linear(i_dim, d_dim).weight is (d_dim, i_dim); we keep the transpose.
    w1 = jax.random.normal(k1, (i_dim, d_dim), dtype=jnp.float32) * 0.1
    w2 = jax.random.normal(k2, (d_dim, r_dim), dtype=jnp.float32) * 0.1
    batch_lengths = jax.random.randint(kl, (b,), 1, l + 1).astype(jnp.int32)

    x_rep_ref, alphas_ref = _reference(x, batch_lengths, w1, w2)

    # Exact-precision run (f32 MXU operands): tight correctness check.
    x_rep, alphas = self_attention(x, batch_lengths, w1, w2,
                                   matmul_dtype=jnp.float32)
    jax.block_until_ready((x_rep, alphas))
    assert x_rep.shape == (b, r_dim * i_dim)
    assert alphas.shape == (b, r_dim, l)
    assert jnp.allclose(x_rep, x_rep_ref, atol=1e-3, rtol=1e-3), \
        float(jnp.max(jnp.abs(x_rep - x_rep_ref)))
    assert jnp.allclose(alphas, alphas_ref, atol=1e-3, rtol=1e-3), \
        float(jnp.max(jnp.abs(alphas - alphas_ref)))

    # Default run (bf16 MXU operands, f32 accumulate + f32 elementwise).
    x_rep_bf, alphas_bf = self_attention(x, batch_lengths, w1, w2)
    jax.block_until_ready((x_rep_bf, alphas_bf))
    assert jnp.allclose(x_rep_bf, x_rep_ref, atol=3e-2, rtol=3e-2), \
        float(jnp.max(jnp.abs(x_rep_bf - x_rep_ref)))
    assert jnp.allclose(alphas_bf, alphas_ref, atol=3e-2, rtol=3e-2), \
        float(jnp.max(jnp.abs(alphas_bf - alphas_ref)))

    print("KERNEL_OK")
</pallas_src>

<mosaic_0001>
module attributes {stable_mosaic.version = 11 : i64} {
  func.func @_self_attention_kernel(%arg0: i32, %arg1: memref<16x8x1xf32, #tpu.memory_space<vmem>>, %arg2: memref<16x8x32xf32, #tpu.memory_space<vmem>>, %arg3: memref<32x16xf32, #tpu.memory_space<vmem>>, %arg4: memref<16x4xf32, #tpu.memory_space<vmem>>, %arg5: memref<4x128xf32, #tpu.memory_space<vmem>>, %arg6: memref<32x128xf32, #tpu.memory_space<vmem>>, %arg7: memref<16x128xf32, #tpu.memory_space<vmem>>, %arg8: memref<16x8x4xf32, #tpu.memory_space<vmem>>) attributes {dimension_semantics = [#tpu.dimension_semantics<parallel>], iteration_bounds = array<i64: 1>, scalar_prefetch = 0 : i64, scratch_operands = 0 : i64, tpu.core_type = #tpu.core_type<tc>, window_params = [{transform_indices = @transform_0, window_bounds = array<i64: 16, 8, 1>}, {transform_indices = @transform_1, window_bounds = array<i64: 16, 8, 32>}, {pipeline_mode = #tpu.pipeline_mode<synchronous>, transform_indices = @transform_2, window_bounds = array<i64: 32, 16>}, {pipeline_mode = #tpu.pipeline_mode<synchronous>, transform_indices = @transform_3, window_bounds = array<i64: 16, 4>}, {pipeline_mode = #tpu.pipeline_mode<synchronous>, transform_indices = @transform_4, window_bounds = array<i64: 4, 128>}, {pipeline_mode = #tpu.pipeline_mode<synchronous>, transform_indices = @transform_5, window_bounds = array<i64: 32, 128>}, {transform_indices = @transform_6, window_bounds = array<i64: 16, 128>}, {transform_indices = @transform_7, window_bounds = array<i64: 16, 8, 4>}]} {
    %c0 = arith.constant 0 : index
    %c0_0 = arith.constant 0 : index
    %c0_1 = arith.constant 0 : index
    %0 = vector.load %arg2[%c0, %c0_0, %c0_1] : memref<16x8x32xf32, #tpu.memory_space<vmem>>, vector<16x8x32xf32>
    %1 = vector.shape_cast %0 : vector<16x8x32xf32> to vector<128x32xf32>
    %c0_2 = arith.constant 0 : index
    %c0_3 = arith.constant 0 : index
    %2 = vector.load %arg3[%c0_2, %c0_3] : memref<32x16xf32, #tpu.memory_space<vmem>>, vector<32x16xf32>
    %cst = arith.constant dense<0.000000e+00> : vector<128x16xf32>
    %3 = tpu.matmul %1, %2, %cst {dimension_numbers = #tpu.dot_dimension_numbers<[1], [0], [0], [1], [0, 0, 1, 1], [], []>} : vector<128x32xf32>, vector<32x16xf32>, vector<128x16xf32> -> vector<128x16xf32>
    %4 = math.tanh %3 : vector<128x16xf32>
    %c0_4 = arith.constant 0 : index
    %c0_5 = arith.constant 0 : index
    %5 = vector.load %arg4[%c0_4, %c0_5] : memref<16x4xf32, #tpu.memory_space<vmem>>, vector<16x4xf32>
    %cst_6 = arith.constant dense<0.000000e+00> : vector<128x4xf32>
    %6 = tpu.matmul %4, %5, %cst_6 {dimension_numbers = #tpu.dot_dimension_numbers<[1], [0], [0], [1], [0, 0, 1, 1], [], []>} : vector<128x16xf32>, vector<16x4xf32>, vector<128x4xf32> -> vector<128x4xf32>
    %7 = vector.shape_cast %6 : vector<128x4xf32> to vector<16x8x4xf32>
    %c0_7 = arith.constant 0 : index
    %c0_8 = arith.constant 0 : index
    %c0_9 = arith.constant 0 : index
    %8 = vector.load %arg1[%c0_7, %c0_8, %c0_9] : memref<16x8x1xf32, #tpu.memory_space<vmem>>, vector<16x8x1xf32>
    %9 = vector.broadcast %8 : vector<16x8x1xf32> to vector<16x8x4xf32>
    %10 = arith.addf %7, %9 : vector<16x8x4xf32>
    %cst_10 = arith.constant dense<0xFF800000> : vector<16x4xf32>
    %11 = vector.multi_reduction <maximumf>, %10, %cst_10 [1] : vector<16x8x4xf32> to vector<16x4xf32>
    %12 = vector.shape_cast %11 : vector<16x4xf32> to vector<16x1x4xf32>
    %13 = vector.broadcast %12 : vector<16x1x4xf32> to vector<16x8x4xf32>
    %14 = arith.subf %10, %13 : vector<16x8x4xf32>
    %15 = math.exp %14 : vector<16x8x4xf32>
    %cst_11 = arith.constant dense<0.000000e+00> : vector<16x4xf32>
    %16 = vector.multi_reduction <add>, %15, %cst_11 [1] : vector<16x8x4xf32> to vector<16x4xf32>
    %17 = vector.shape_cast %16 : vector<16x4xf32> to vector<16x1x4xf32>
    %18 = tpu.reciprocal %17 : vector<16x1x4xf32> -> vector<16x1x4xf32>
    %19 = vector.broadcast %18 : vector<16x1x4xf32> to vector<16x8x4xf32>
    %20 = arith.mulf %15, %19 : vector<16x8x4xf32>
    %c0_12 = arith.constant 0 : index
    %c0_13 = arith.constant 0 : index
    %c0_14 = arith.constant 0 : index
    %21 = vector.load %arg8[%c0_12, %c0_13, %c0_14] : memref<16x8x4xf32, #tpu.memory_space<vmem>>, vector<16x8x4xf32>
    tpu.vector_store %arg8[%c0_12, %c0_13, %c0_14], %20 {strides = array<i32>} : memref<16x8x4xf32, #tpu.memory_space<vmem>>, vector<16x8x4xf32>,
    %22 = vector.shape_cast %20 : vector<16x8x4xf32> to vector<128x4xf32>
    %c0_15 = arith.constant 0 : index
    %c0_16 = arith.constant 0 : index
    %23 = vector.load %arg5[%c0_15, %c0_16] : memref<4x128xf32, #tpu.memory_space<vmem>>, vector<4x128xf32>
    %cst_17 = arith.constant dense<0.000000e+00> : vector<128x128xf32>
    %24 = tpu.matmul %22, %23, %cst_17 {dimension_numbers = #tpu.dot_dimension_numbers<[1], [0], [0], [1], [0, 0, 1, 1], [], []>} : vector<128x4xf32>, vector<4x128xf32>, vector<128x128xf32> -> vector<128x128xf32>
    %c0_18 = arith.constant 0 : index
    %c0_19 = arith.constant 0 : index
    %25 = vector.load %arg6[%c0_18, %c0_19] : memref<32x128xf32, #tpu.memory_space<vmem>>, vector<32x128xf32>
    %cst_20 = arith.constant dense<0.000000e+00> : vector<128x128xf32>
    %26 = tpu.matmul %1, %25, %cst_20 {dimension_numbers = #tpu.dot_dimension_numbers<[1], [0], [0], [1], [0, 0, 1, 1], [], []>} : vector<128x32xf32>, vector<32x128xf32>, vector<128x128xf32> -> vector<128x128xf32>
    %27 = arith.mulf %24, %26 : vector<128x128xf32>
    %28 = vector.shape_cast %27 : vector<128x128xf32> to vector<16x8x128xf32>
    %cst_21 = arith.constant dense<0.000000e+00> : vector<16x128xf32>
    %29 = vector.multi_reduction <add>, %28, %cst_21 [1] : vector<16x8x128xf32> to vector<16x128xf32>
    %c0_22 = arith.constant 0 : index
    %c0_23 = arith.constant 0 : index
    %30 = vector.load %arg7[%c0_22, %c0_23] : memref<16x128xf32, #tpu.memory_space<vmem>>, vector<16x128xf32>
    tpu.vector_store %arg7[%c0_22, %c0_23], %29 {strides = array<i32>} : memref<16x128xf32, #tpu.memory_space<vmem>>, vector<16x128xf32>,
    return
  }
  func.func @transform_0(%arg0: i32) -> (i32, i32, i32) {
    %c0_i32 = arith.constant 0 : i32
    %c0_i32_0 = arith.constant 0 : i32
    %c0_i32_1 = arith.constant 0 : i32
    return %arg0, %c0_i32, %c0_i32_0 : i32, i32, i32
  }
  func.func @transform_1(%arg0: i32) -> (i32, i32, i32) {
    %c0_i32 = arith.constant 0 : i32
    %c0_i32_0 = arith.constant 0 : i32
    %c0_i32_1 = arith.constant 0 : i32
    return %arg0, %c0_i32, %c0_i32_0 : i32, i32, i32
  }
  func.func @transform_2(%arg0: i32) -> (i32, i32) {
    %c0_i32 = arith.constant 0 : i32
    %c0_i32_0 = arith.constant 0 : i32
    %c0_i32_1 = arith.constant 0 : i32
    return %c0_i32, %c0_i32_0 : i32, i32
  }
  func.func @transform_3(%arg0: i32) -> (i32, i32) {
    %c0_i32 = arith.constant 0 : i32
    %c0_i32_0 = arith.constant 0 : i32
    %c0_i32_1 = arith.constant 0 : i32
    return %c0_i32, %c0_i32_0 : i32, i32
  }
  func.func @transform_4(%arg0: i32) -> (i32, i32) {
    %c0_i32 = arith.constant 0 : i32
    %c0_i32_0 = arith.constant 0 : i32
    %c0_i32_1 = arith.constant 0 : i32
    return %c0_i32, %c0_i32_0 : i32, i32
  }
  func.func @transform_5(%arg0: i32) -> (i32, i32) {
    %c0_i32 = arith.constant 0 : i32
    %c0_i32_0 = arith.constant 0 : i32
    %c0_i32_1 = arith.constant 0 : i32
    return %c0_i32, %c0_i32_0 : i32, i32
  }
  func.func @transform_6(%arg0: i32) -> (i32, i32) {
    %c0_i32 = arith.constant 0 : i32
    %c0_i32_0 = arith.constant 0 : i32
    return %arg0, %c0_i32 : i32, i32
  }
  func.func @transform_7(%arg0: i32) -> (i32, i32, i32) {
    %c0_i32 = arith.constant 0 : i32
    %c0_i32_0 = arith.constant 0 : i32
    %c0_i32_1 = arith.constant 0 : i32
    return %arg0, %c0_i32, %c0_i32_0 : i32, i32, i32
  }
}

</mosaic_0001>

<bundles_post_ra>
// kernel: _self_attention_impl.1
= control target key start
LH: loop header
LB: loop body
LE: loop exit
PB: predicated region body
PF: predicated region fallthrough
CT: control target
= control target key end

     0   :  { %vm46_vm0 = vcmask 261120   ;;  %s2405_s0 = inlined_call_operand.vmem [shape: f32[16,8,1], index: 0, kind: input, shape index: {}]   ;;  %s2406_s1 = inlined_call_operand.vmem [shape: f32[16,8,32], index: 1, kind: input, shape index: {}]   ;;  %s2407_s2 = inlined_call_operand.vmem [shape: f32[32,16], index: 2, kind: input, shape index: {}]   ;;  %s2408_s3 = inlined_call_operand.vmem [shape: f32[16,4], index: 3, kind: input, shape index: {}]   ;;  %s2409_s4 = inlined_call_operand.vmem [shape: f32[4,128], index: 4, kind: input, shape index: {}]   ;;  %s2410_s5 = inlined_call_operand.vmem [shape: f32[32,128], index: 5, kind: input, shape index: {}]   ;;  %s2411_s6 = inlined_call_operand.hbm [shape: f32[16,128], index: 6, kind: output, shape index: {0}]   ;;  %s2412_s7 = inlined_call_operand.vmem [shape: f32[16,8,4], index: 7, kind: output, shape index: {1}]  }
   0x1   :  { %v42_v0 = vld [vmem:[%s2407_s2] sm:$0xff]  ;;  %v43_v1 = vld [vmem:[%s2407_s2 + $0x8] sm:$0xff]  ;;  %v44_v2 = vld [vmem:[%s2407_s2 + $0x10] sm:$0xff] }
   0x2   :  { %v1663_v3 = vpack.c.bf16 %v43_v1, %v42_v0  ;;  %v45_v4 = vld [vmem:[%s2407_s2 + $0x18] sm:$0xff]  ;;  %v26_v5 = vld [vmem:[%s2406_s1] sm:$0xff] }
   0x3   :  { %v1667_v6 = vpack.c.bf16 %v45_v4, %v44_v2  ;;  %1553 = vmatprep.mubr.msk.f32.mxu0 %vm46_vm0, %v26_v5 }
   0x4   :  { %1664 = vmatprep.subr.bf16.mxu0 %v1663_v3 }
   0x5   :  { %1666 = vmatpush3.bf16.msra.mxu0 %v1663_v3 }
   0x6   :  { %1668 = vmatprep.subr.bf16.mxu0 %v1667_v6 }
   0x7   :  { %13 = vsyncpa [#allocation3], 0  ;;  %v1872_v7 = vld [vmem:[%s2406_s1 + $0x8] sm:$0xff]  ;;  %v1877_v8 = vld [vmem:[%s2406_s1 + $0x10] sm:$0xff]  ;;  %v1809_v27 = vmov 0   ;;  %vm258_vm1 = vcmask 130048  }
   0x8   :  { %v1886_v9 = vld [vmem:[%s2406_s1 + $0x18] sm:$0xff]  ;;  %v1891_v10 = vld [vmem:[%s2406_s1 + $0x20] sm:$0xff]  ;;  %v1900_v11 = vld [vmem:[%s2406_s1 + $0x28] sm:$0xff]  ;;  %1687 = vset.pattern.permute.xlu0 %v1809_v27  ;;  %1688 = vset.pattern.permute.xlu1 %v1809_v27  ;;  %vm934_vm2 = vcmask 1043456   ;;  %vm564_vm3 = vcmask 31744   ;;  %vm1360_vm4 = vcmask 1041409  }
   0x9   :  { %1670 = vmatpush3.bf16.msra.mxu0 %v1667_v6  ;;  %v1905_v12 = vld [vmem:[%s2406_s1 + $0x30] sm:$0xff]  ;;  %v1914_v13 = vld [vmem:[%s2406_s1 + $0x38] sm:$0xff]  ;;  %v1919_v14 = vld [vmem:[%s2406_s1 + $0x40] sm:$0xff]  ;;  %vm1362_vm5 = vcmask 1042434   ;;  %vm1364_vm6 = vcmask 1043459   ;;  %vm1366_vm7 = vcmask 1044484  }
   0xa   :  { %v1928_v15 = vld [vmem:[%s2406_s1 + $0x48] sm:$0xff]  ;;  %v1933_v16 = vld [vmem:[%s2406_s1 + $0x50] sm:$0xff]  ;;  %v1942_v17 = vld [vmem:[%s2406_s1 + $0x58] sm:$0xff]  ;;  %vm1368_vm8 = vcmask 1045509   ;;  %vm1370_vm9 = vcmask 1046534   ;;  %vm1372_vm10 = vcmask 1047559  }
   0xb   :  { %v1947_v18 = vld [vmem:[%s2406_s1 + $0x60] sm:$0xff]  ;;  %v1956_v19 = vld [vmem:[%s2406_s1 + $0x68] sm:$0xff]  ;;  %v1961_v20 = vld [vmem:[%s2406_s1 + $0x70] sm:$0xff] }
   0xc   :  { %1554 = vmatmul.mubr.msk.f32.vlgmr.msra.gmra.mrb[0].mxu0 %vm46_vm0, %v1872_v7  ;;  %v1970_v21 = vld [vmem:[%s2406_s1 + $0x78] sm:$0xff]  ;;  %v256_v22 = vld [vmem:[%s2408_s3] sm:$0xff]  ;;  %v257_v23 = vld [vmem:[%s2408_s3 + $0x8] sm:$0xff] }
   0xd   :  { %1556 = vmatprep.mubr.msk.f32.mxu0 %vm46_vm0, %v1877_v8  ;;  %v1671_v24 = vpack.c.bf16 %v257_v23, %v256_v22  ;;  %v452_v25 = vld [vmem:[%s2405_s0] sm:$0xff]  ;;  %v454_v26 = vld [vmem:[%s2405_s0 + $0x10] sm:$0xff]  ;;  %v453_v28 = vld [vmem:[%s2405_s0 + $0x8] sm:$0xff] }
   0xe   :  { %470 = vperm.xlu0 %1687, %v452_v25   ;;  %480 = vperm.xlu1 %1688, %v454_v26   ;;  %v455_v29 = vld [vmem:[%s2405_s0 + $0x18] sm:$0xff]  ;;  %v456_v30 = vld [vmem:[%s2405_s0 + $0x20] sm:$0xff]  ;;  %v457_v31 = vld [vmem:[%s2405_s0 + $0x28] sm:$0xff] }
   0xf   :  { %1672 = vmatprep.subr.bf16.mxu1 %v1671_v24  ;;  %v458_v32 = vld [vmem:[%s2405_s0 + $0x30] sm:$0xff]  ;;  %v459_v33 = vld [vmem:[%s2405_s0 + $0x38] sm:$0xff]  ;;  %v460_v34 = vld [vmem:[%s2405_s0 + $0x40] sm:$0xff] }
  0x10   :  { %1557 = vmatmul.mubr.msk.f32.gmra.mrb[2].mxu0 %vm46_vm0, %v1886_v9  ;;  %1674 = vmatpush3.bf16.msra.mxu1 %v1671_v24  ;;  %v461_v35 = vld [vmem:[%s2405_s0 + $0x48] sm:$0xff]  ;;  %v462_v36 = vld [vmem:[%s2405_s0 + $0x50] sm:$0xff]  ;;  %v463_v37 = vld [vmem:[%s2405_s0 + $0x58] sm:$0xff] }
  0x11   :  { %1559 = vmatprep.mubr.msk.f32.mxu0 %vm46_vm0, %v1891_v10  ;;  %v464_v38 = vld [vmem:[%s2405_s0 + $0x60] sm:$0xff]  ;;  %v465_v39 = vld [vmem:[%s2405_s0 + $0x68] sm:$0xff]  ;;  %v466_v40 = vld [vmem:[%s2405_s0 + $0x70] sm:$0xff] }
  0x12   :  { %475 = vperm.xlu0 %1687, %v453_v28   ;;  %485 = vperm.xlu1 %1688, %v455_v29   ;;  %v467_v41 = vld [vmem:[%s2405_s0 + $0x78] sm:$0xff]  ;;  %v1083_v25 = vld [vmem:[%s2410_s5] sm:$0xff]  ;;  %v1084_v26 = vld [vmem:[%s2410_s5 + $0x8] sm:$0xff] }
  0x13   :  { %v1675_v27 = vpack.c.bf16 %v1084_v26, %v1083_v25  ;;  %v1085_v28 = vld [vmem:[%s2410_s5 + $0x10] sm:$0xff]  ;;  %v1086_v29 = vld [vmem:[%s2410_s5 + $0x18] sm:$0xff] }
  0x14   :  { %1560 = vmatmul.mubr.msk.f32.gmra.mrb[4].mxu0 %vm46_vm0, %v1900_v11 }
  0x15   :  { %1562 = vmatprep.mubr.msk.f32.mxu0 %vm46_vm0, %v1905_v12  ;;  %1676 = vmatprep.subr.bf16.mxu0 %v1675_v27 }
  0x16   :  { %490 = vperm.xlu0 %1687, %v456_v30   ;;  %495 = vperm.xlu1 %1688, %v457_v31   ;;  %v1679_v30 = vpack.c.bf16 %v1086_v29, %v1085_v28  ;;  %v885_v31 = vld [vmem:[%s2409_s4] sm:$0xf] }
  0x17   :  { %1678 = vmatpush3.bf16.msra.mxu0 %v1675_v27  ;;  %1605 = vmatprep.subr.msk.mxu1 %vm934_vm2, %v885_v31 }
  0x18   :  { %1563 = vmatmul.mubr.msk.f32.gmra.mrb[6].mxu0 %vm46_vm0, %v1914_v13  ;;  %1680 = vmatprep.subr.bf16.mxu0 %v1679_v30 }
  0x19   :  { %1565 = vmatprep.mubr.msk.f32.mxu0 %vm46_vm0, %v1919_v14 }
  0x1a   :  { %500 = vperm.xlu0 %1687, %v458_v32   ;;  %505 = vperm.xlu1 %1688, %v459_v33  }
  0x1b   :  { %1682 = vmatpush3.bf16.msra.mxu0 %v1679_v30 }
  0x1c   :  { %1566 = vmatmul.mubr.msk.f32.gmra.mrb[8].mxu0 %vm46_vm0, %v1928_v15 }
  0x1d   :  { %1568 = vmatprep.mubr.msk.f32.mxu0 %vm46_vm0, %v1933_v16 }
  0x1e   :  { %510 = vperm.xlu0 %1687, %v460_v34   ;;  %515 = vperm.xlu1 %1688, %v461_v35  }
  0x20   :  { %1569 = vmatmul.mubr.msk.f32.gmra.mrb[10].mxu0 %vm46_vm0, %v1942_v17 }
  0x21   :  { %1571 = vmatprep.mubr.msk.f32.mxu0 %vm46_vm0, %v1947_v18 }
  0x22   :  { %520 = vperm.xlu0 %1687, %v462_v36   ;;  %525 = vperm.xlu1 %1688, %v463_v37  }
  0x24   :  { %1572 = vmatmul.mubr.msk.f32.gmra.mrb[12].mxu0 %vm46_vm0, %v1956_v19 }
  0x25   :  { %1574 = vmatprep.mubr.msk.f32.mxu0 %vm46_vm0, %v1961_v20 }
  0x26   :  { %530 = vperm.xlu0 %1687, %v464_v38   ;;  %535 = vperm.xlu1 %1688, %v465_v39  }
  0x28   :  { %1575 = vmatmul.mubr.msk.f32.gmra.mrb[14].mxu0 %vm46_vm0, %v1970_v21 }
  0x29   :  { %1639 = vmatprep.mubr.msk.f32.mxu0 %vm46_vm0, %v26_v5 }
  0x2a   :  { %540 = vperm.xlu0 %1687, %v466_v40   ;;  %545 = vperm.xlu1 %1688, %v467_v41  }
  0x2c   :  { %1640 = vmatmul.mubr.msk.f32.vlgmr.msra.gmra.mrb[16].mxu0 %vm46_vm0, %v1872_v7 }
  0x2d   :  { %1642 = vmatprep.mubr.msk.f32.mxu0 %vm46_vm0, %v1877_v8 }
  0x30   :  { %1643 = vmatmul.mubr.msk.f32.gmra.mrb[18].mxu0 %vm46_vm0, %v1886_v9 }
  0x31   :  { %1645 = vmatprep.mubr.msk.f32.mxu0 %vm46_vm0, %v1891_v10 }
  0x34   :  { %1646 = vmatmul.mubr.msk.f32.gmra.mrb[20].mxu0 %vm46_vm0, %v1900_v11 }
  0x35   :  { %1648 = vmatprep.mubr.msk.f32.mxu0 %vm46_vm0, %v1905_v12 }
  0x38   :  { %1649 = vmatmul.mubr.msk.f32.gmra.mrb[22].mxu0 %vm46_vm0, %v1914_v13 }
  0x39   :  { %1651 = vmatprep.mubr.msk.f32.mxu0 %vm46_vm0, %v1919_v14 }
  0x3c   :  { %1652 = vmatmul.mubr.msk.f32.gmra.mrb[24].mxu0 %vm46_vm0, %v1928_v15 }
  0x3d   :  { %1654 = vmatprep.mubr.msk.f32.mxu0 %vm46_vm0, %v1933_v16 }
  0x40   :  { %1655 = vmatmul.mubr.msk.f32.gmra.mrb[26].mxu0 %vm46_vm0, %v1942_v17 }
  0x41   :  { %1657 = vmatprep.mubr.msk.f32.mxu0 %vm46_vm0, %v1947_v18 }
  0x44   :  { %1658 = vmatmul.mubr.msk.f32.gmra.mrb[28].mxu0 %vm46_vm0, %v1956_v19 }
  0x45   :  { %1660 = vmatprep.mubr.msk.f32.mxu0 %vm46_vm0, %v1961_v20 }
  0x48   :  { %1661 = vmatmul.mubr.msk.f32.gmra.mrb[30].mxu0 %vm46_vm0, %v1970_v21 }
  0x8d   :  { %v471_v7 = vpop.permute.xlu0 %470  ;;  %v481_v8 = vpop.permute.xlu1 %480 }
  0x91   :  { %v476_v9 = vpop.permute.xlu0 %475  ;;  %v486_v10 = vpop.permute.xlu1 %485 }
  0x95   :  { %v496_v32 = vpop.permute.xlu1 %495  ;;  %v491_v35 = vpop.permute.xlu0 %490 }
  0xdf   :  { %v1555_v42 = vpop.f32.mrb[0].mxu0 }
  0xe0   :  { %v161_v43 = vpop.f32.mrb[1].mxu0 }
  0xe1   :  { %1689 = vtanh.f32 %v161_v43 }
  0xe2   :  { %1691 = vtanh.f32 %v1555_v42 }
  0xe3   :  { %v1558_v44 = vpop.f32.mrb[2].mxu0 }
  0xe4   :  { %v171_v45 = vpop.f32.mrb[3].mxu0 }
  0xe5   :  { %1693 = vtanh.f32 %v171_v45 }
  0xe6   :  { %1695 = vtanh.f32 %v1558_v44 }
  0xe7   :  { %v1561_v46 = vpop.f32.mrb[4].mxu0 }
  0xe8   :  { %v181_v47 = vpop.f32.mrb[5].mxu0 }
  0xe9   :  { %1697 = vtanh.f32 %v181_v47 }
  0xea   :  { %1699 = vtanh.f32 %v1561_v46 }
  0xeb   :  { %v1690_v48 = vpop.eup %1689  ;;  %v1564_v49 = vpop.f32.mrb[6].mxu0 }
  0xec   :  { %v1692_v50 = vpop.eup %1691  ;;  %v191_v51 = vpop.f32.mrb[7].mxu0  ;;  %1581 = vmatprep.mubr.msk.f32.mxu1 %vm258_vm1, %v1690_v48 }
  0xed   :  { %1701 = vtanh.f32 %v191_v51  ;;  %1582 = vmatmul.mubr.msk.f32.vlgmr.msra.gmra.mrb[0].mxu1 %vm258_vm1, %v1692_v50 }
  0xee   :  { %1703 = vtanh.f32 %v1564_v49  ;;  %1606 = vmatpush3.msk.msra.mxu1 %vm934_vm2, %v885_v31 }
  0xef   :  { %v1694_v52 = vpop.eup %1693  ;;  %v1567_v53 = vpop.f32.mrb[8].mxu0 }
  0xf0   :  { %v1696_v54 = vpop.eup %1695  ;;  %v201_v55 = vpop.f32.mrb[9].mxu0  ;;  %1584 = vmatprep.mubr.msk.f32.mxu1 %vm258_vm1, %v1694_v52 }
  0xf1   :  { %1705 = vtanh.f32 %v201_v55  ;;  %1585 = vmatmul.mubr.msk.f32.gmra.mrb[2].mxu1 %vm258_vm1, %v1696_v54  ;;  %v506_v52 = vpop.permute.xlu1 %505 }
  0xf2   :  { %1707 = vtanh.f32 %v1567_v53 }
  0xf3   :  { %v1698_v56 = vpop.eup %1697  ;;  %v1570_v57 = vpop.f32.mrb[10].mxu0 }
  0xf4   :  { %v1700_v58 = vpop.eup %1699  ;;  %v211_v59 = vpop.f32.mrb[11].mxu0  ;;  %1587 = vmatprep.mubr.msk.f32.mxu1 %vm258_vm1, %v1698_v56 }
  0xf5   :  { %1709 = vtanh.f32 %v211_v59  ;;  %1588 = vmatmul.mubr.msk.f32.gmra.mrb[4].mxu1 %vm258_vm1, %v1700_v58  ;;  %v501_v58 = vpop.permute.xlu0 %500 }
  0xf6   :  { %1711 = vtanh.f32 %v1570_v57 }
  0xf7   :  { %v1702_v60 = vpop.eup %1701  ;;  %v1573_v61 = vpop.f32.mrb[12].mxu0 }
  0xf8   :  { %v1704_v62 = vpop.eup %1703  ;;  %v221_v63 = vpop.f32.mrb[13].mxu0  ;;  %1590 = vmatprep.mubr.msk.f32.mxu1 %vm258_vm1, %v1702_v60 }
  0xf9   :  { %1713 = vtanh.f32 %v221_v63  ;;  %1591 = vmatmul.mubr.msk.f32.gmra.mrb[6].mxu1 %vm258_vm1, %v1704_v62 }
  0xfa   :  { %1715 = vtanh.f32 %v1573_v61 }
  0xfb   :  { %v1706_v0 = vpop.eup %1705  ;;  %v1576_v1 = vpop.f32.mrb[14].mxu0 }
  0xfc   :  { %v1708_v2 = vpop.eup %1707  ;;  %v231_v3 = vpop.f32.mrb[15].mxu0  ;;  %1593 = vmatprep.mubr.msk.f32.mxu1 %vm258_vm1, %v1706_v0 }
  0xfd   :  { %1717 = vtanh.f32 %v231_v3  ;;  %1594 = vmatmul.mubr.msk.f32.gmra.mrb[8].mxu1 %vm258_vm1, %v1708_v2 }
  0xfe   :  { %1719 = vtanh.f32 %v1576_v1 }
  0xff   :  { %v1710_v4 = vpop.eup %1709 }
 0x100   :  { %v1712_v5 = vpop.eup %1711  ;;  %1596 = vmatprep.mubr.msk.f32.mxu1 %vm258_vm1, %v1710_v4 }
 0x101   :  { %1597 = vmatmul.mubr.msk.f32.gmra.mrb[10].mxu1 %vm258_vm1, %v1712_v5 }
 0x103   :  { %v1714_v6 = vpop.eup %1713 }
 0x104   :  { %v1716_v22 = vpop.eup %1715  ;;  %1599 = vmatprep.mubr.msk.f32.mxu1 %vm258_vm1, %v1714_v6 }
 0x105   :  { %1600 = vmatmul.mubr.msk.f32.gmra.mrb[12].mxu1 %vm258_vm1, %v1716_v22 }
 0x107   :  { %v1718_v23 = vpop.eup %1717 }
 0x108   :  { %v1720_v24 = vpop.eup %1719  ;;  %1602 = vmatprep.mubr.msk.f32.mxu1 %vm258_vm1, %v1718_v23 }
 0x109   :  { %1603 = vmatmul.mubr.msk.f32.gmra.mrb[14].mxu1 %vm258_vm1, %v1720_v24 }
 0x1c0   :  { %v1583_v11 = vpop.f32.mrb[0].mxu1 }
 0x1c1   :  { %v549_v12 = vadd.f32 %v1583_v11, %v476_v9  ;;  %v373_v13 = vpop.f32.mrb[1].mxu1 }
 0x1c2   :  { %v2090_v14 = vadd.f32 %v471_v7, %v373_v13  ;;  %v516_v13 = vpop.permute.xlu1 %515 }
 0x1c3   :  { %v572_v15 = vsel %vm564_vm3, %v549_v12, -inf }
 0x1c4   :  { %v573_v16 = vrot.slane %v572_v15, 4  ;;  %v565_v17 = vsel %vm564_vm3, %v2090_v14, -inf  ;;  %v1586_v18 = vpop.f32.mrb[2].mxu1 }
 0x1c5   :  { %v566_v19 = vrot.slane %v565_v17, 4  ;;  %v2095_v20 = vadd.f32 %v1586_v18, %v486_v10  ;;  %v383_v21 = vpop.f32.mrb[3].mxu1 }
 0x1c6   :  { %v574_v33 = vmax.f32 %v572_v15, %v573_v16  ;;  %v2097_v34 = vadd.f32 %v481_v8, %v383_v21 }
 0x1c7   :  { %v567_v36 = vmax.f32 %v565_v17, %v566_v19  ;;  %v586_v37 = vsel %vm564_vm3, %v2095_v20, -inf }
 0x1c8   :  { %v575_v38 = vrot.slane %v574_v33, 2  ;;  %v587_v39 = vrot.slane %v586_v37, 4  ;;  %v579_v40 = vsel %vm564_vm3, %v2097_v34, -inf  ;;  %v1589_v41 = vpop.f32.mrb[4].mxu1 }
 0x1c9   :  { %v568_v42 = vrot.slane %v567_v36, 2  ;;  %v580_v43 = vrot.slane %v579_v40, 4  ;;  %v2103_v44 = vadd.f32 %v1589_v41, %v496_v32  ;;  %v393_v45 = vpop.f32.mrb[5].mxu1 }
 0x1ca   :  { %v576_v46 = vmax.f32 %v574_v33, %v575_v38  ;;  %v588_v47 = vmax.f32 %v586_v37, %v587_v39  ;;  %v2105_v48 = vadd.f32 %v491_v35, %v393_v45  ;;  %v511_v37 = vpop.permute.xlu0 %510 }
 0x1cb   :  { %v569_v49 = vmax.f32 %v567_v36, %v568_v42  ;;  %v581_v50 = vmax.f32 %v579_v40, %v580_v43  ;;  %v600_v51 = vsel %vm564_vm3, %v2103_v44, -inf }
 0x1cc   :  { %v577_v53 = vrot.slane %v576_v46, 1  ;;  %v589_v54 = vrot.slane %v588_v47, 2  ;;  %v601_v55 = vrot.slane %v600_v51, 4  ;;  %v593_v56 = vsel %vm564_vm3, %v2105_v48, -inf  ;;  %v1592_v57 = vpop.f32.mrb[6].mxu1 }
 0x1cd   :  { %v570_v59 = vrot.slane %v569_v49, 1  ;;  %v582_v60 = vrot.slane %v581_v50, 2  ;;  %v594_v61 = vrot.slane %v593_v56, 4  ;;  %v2111_v62 = vadd.f32 %v1592_v57, %v506_v52  ;;  %v403_v63 = vpop.f32.mrb[7].mxu1 }
 0x1ce   :  { %v578_v0 = vmax.f32 %v576_v46, %v577_v53  ;;  %v590_v1 = vmax.f32 %v588_v47, %v589_v54  ;;  %v602_v2 = vmax.f32 %v600_v51, %v601_v55  ;;  %v2113_v3 = vadd.f32 %v501_v58, %v403_v63 }
 0x1cf   :  { %v571_v4 = vmax.f32 %v569_v49, %v570_v59  ;;  %v583_v5 = vmax.f32 %v581_v50, %v582_v60  ;;  %v595_v6 = vmax.f32 %v593_v56, %v594_v61  ;;  %v614_v22 = vsel %vm564_vm3, %v2111_v62, -inf  ;;  %v526_v50 = vpop.permute.xlu1 %525 }
 0x1d0   :  { %v678_v23 = vsub.f32 %v549_v12, %v578_v0  ;;  %v591_v24 = vrot.slane %v590_v1, 1  ;;  %v603_v25 = vrot.slane %v602_v2, 2  ;;  %v615_v26 = vrot.slane %v614_v22, 4  ;;  %v1595_v27 = vpop.f32.mrb[8].mxu1 }
 0x1d1   :  { %v677_v28 = vsub.f32 %v2090_v14, %v571_v4  ;;  %v584_v29 = vrot.slane %v583_v5, 1  ;;  %v596_v30 = vrot.slane %v595_v6, 2  ;;  %v607_v31 = vsel %vm564_vm3, %v2113_v3, -inf  ;;  %v413_v7 = vpop.f32.mrb[9].mxu1 }
 0x1d2   :  { %v695_v8 = vmul.f32 1.442695, %v678_v23  ;;  %v592_v9 = vmax.f32 %v590_v1, %v591_v24  ;;  %v604_v10 = vmax.f32 %v602_v2, %v603_v25  ;;  %v616_v11 = vmax.f32 %v614_v22, %v615_v26  ;;  %v521_v1 = vpop.permute.xlu0 %520 }
 0x1d3   :  { %v693_v15 = vmul.f32 1.442695, %v677_v28  ;;  %v585_v16 = vmax.f32 %v583_v5, %v584_v29  ;;  %v597_v12 = vmax.f32 %v595_v6, %v596_v30  ;;  %v608_v17 = vrot.slane %v607_v31, 4 }
 0x1d4   :  { %1721 = vpow2.f32 %v695_v8  ;;  %v680_v18 = vsub.f32 %v2095_v20, %v592_v9  ;;  %v605_v19 = vrot.slane %v604_v10, 1  ;;  %v617_v14 = vrot.slane %v616_v11, 2  ;;  %v1598_v21 = vpop.f32.mrb[10].mxu1 }
 0x1d5   :  { %1723 = vpow2.f32 %v693_v15  ;;  %v679_v32 = vsub.f32 %v2097_v34, %v585_v16  ;;  %v598_v33 = vrot.slane %v597_v12, 1  ;;  %v609_v35 = vmax.f32 %v607_v31, %v608_v17  ;;  %v423_v36 = vpop.f32.mrb[11].mxu1 }
 0x1d6   :  { %v699_v38 = vmul.f32 1.442695, %v680_v18  ;;  %v606_v39 = vmax.f32 %v604_v10, %v605_v19  ;;  %v618_v40 = vmax.f32 %v616_v11, %v617_v14  ;;  %v2122_v41 = vadd.f32 %v1595_v27, %v516_v13  ;;  %v536_v14 = vpop.permute.xlu1 %535 }
 0x1d7   :  { %v697_v42 = vmul.f32 1.442695, %v679_v32  ;;  %v599_v43 = vmax.f32 %v597_v12, %v598_v33  ;;  %v610_v45 = vrot.slane %v609_v35, 2  ;;  %v2124_v46 = vadd.f32 %v511_v37, %v413_v7 }
 0x1d8   :  { %1725 = vpow2.f32 %v699_v38  ;;  %v682_v20 = vsub.f32 %v2103_v44, %v606_v39  ;;  %v619_v47 = vrot.slane %v618_v40, 1  ;;  %v628_v34 = vsel %vm564_vm3, %v2122_v41, -inf  ;;  %v1601_v49 = vpop.f32.mrb[12].mxu1 }
 0x1d9   :  { %1727 = vpow2.f32 %v697_v42  ;;  %v681_v51 = vsub.f32 %v2105_v48, %v599_v43  ;;  %v611_v52 = vmax.f32 %v609_v35, %v610_v45  ;;  %v629_v53 = vrot.slane %v628_v34, 4  ;;  %v2130_v54 = vpop.f32.mrb[13].mxu1 }
 0x1da   :  { %v703_v55 = vmul.f32 1.442695, %v682_v20  ;;  %v620_v56 = vmax.f32 %v618_v40, %v619_v47  ;;  %v621_v57 = vsel %vm564_vm3, %v2124_v46, -inf  ;;  %v2134_v58 = vadd.f32 %v1598_v21, %v526_v50 }
 0x1db   :  { %v701_v44 = vmul.f32 1.442695, %v681_v51  ;;  %v612_v59 = vrot.slane %v611_v52, 1  ;;  %v630_v60 = vmax.f32 %v628_v34, %v629_v53  ;;  %v622_v61 = vrot.slane %v621_v57, 4 }
 0x1dc   :  { %1729 = vpow2.f32 %v703_v55  ;;  %v684_v63 = vsub.f32 %v2111_v62, %v620_v56  ;;  %v642_v48 = vsel %vm564_vm3, %v2134_v58, -inf  ;;  %v2139_v0 = vpop.f32.mrb[14].mxu1  ;;  %v2145_v25 = vadd.f32 %v521_v1, %v423_v36 }
 0x1dd   :  { %1731 = vpow2.f32 %v701_v44  ;;  %v613_v2 = vmax.f32 %v611_v52, %v612_v59  ;;  %v631_v4 = vrot.slane %v630_v60, 2  ;;  %v623_v5 = vmax.f32 %v621_v57, %v622_v61  ;;  %v2141_v6 = vpop.f32.mrb[15].mxu1 }
 0x1de   :  { %v2143_v22 = vpop.eup %1721  ;;  %v707_v23 = vmul.f32 1.442695, %v684_v63  ;;  %v643_v24 = vrot.slane %v642_v48, 4  ;;  %v635_v12 = vsel %vm564_vm3, %v2145_v25, -inf  ;;  %v2165_v39 = vadd.f32 %v1601_v49, %v536_v14  ;;  %v546_v14 = vpop.permute.xlu1 %545 }
 0x1df   :  { %v2147_v26 = vpop.eup %1723  ;;  %v732_v62 = vsel %vm564_vm3, %v2143_v22, 0.0  ;;  %v683_v27 = vsub.f32 %v2113_v3, %v613_v2  ;;  %v632_v28 = vmax.f32 %v630_v60, %v631_v4  ;;  %v624_v29 = vrot.slane %v623_v5, 2 }
 0x1e0   :  { %v733_v30 = vrot.slane %v732_v62, 4  ;;  %v725_v31 = vsel %vm564_vm3, %v2147_v26, 0.0  ;;  %1733 = vpow2.f32 %v707_v23  ;;  %v644_v7 = vmax.f32 %v642_v48, %v643_v24  ;;  %v531_v23 = vpop.permute.xlu0 %530 }
 0x1e1   :  { %v726_v8 = vrot.slane %v725_v31, 4  ;;  %v705_v9 = vmul.f32 1.442695, %v683_v27  ;;  %v633_v10 = vrot.slane %v632_v28, 1  ;;  %v625_v11 = vmax.f32 %v623_v5, %v624_v29 }
 0x1e2   :  { %v2154_v13 = vpop.eup %1725  ;;  %v734_v15 = vadd.f32 %v733_v30, %v732_v62  ;;  %v645_v16 = vrot.slane %v644_v7, 2  ;;  %v636_v38 = vrot.slane %v635_v12, 4 }
 0x1e3   :  { %v2158_v3 = vpop.eup %1727  ;;  %v727_v17 = vadd.f32 %v726_v8, %v725_v31  ;;  %v746_v18 = vsel %vm564_vm3, %v2154_v13, 0.0  ;;  %1735 = vpow2.f32 %v705_v9  ;;  %v634_v19 = vmax.f32 %v632_v28, %v633_v10 }
 0x1e4   :  { %v735_v21 = vrot.slane %v734_v15, 2  ;;  %v747_v32 = vrot.slane %v746_v18, 4  ;;  %v739_v33 = vsel %vm564_vm3, %v2158_v3, 0.0  ;;  %v626_v35 = vrot.slane %v625_v11, 1 }
 0x1e5   :  { %v740_v36 = vrot.slane %v739_v33, 4  ;;  %v686_v37 = vsub.f32 %v2122_v41, %v634_v19  ;;  %v728_v43 = vrot.slane %v727_v17, 2  ;;  %v646_v52 = vmax.f32 %v644_v7, %v645_v16 }
 0x1e6   :  { %v2167_v40 = vpop.eup %1729  ;;  %v736_v42 = vadd.f32 %v735_v21, %v734_v15  ;;  %v748_v45 = vadd.f32 %v747_v32, %v746_v18  ;;  %v627_v20 = vmax.f32 %v625_v11, %v626_v35  ;;  %v637_v44 = vmax.f32 %v635_v12, %v636_v38 }
 0x1e7   :  { %v2169_v47 = vpop.eup %1731  ;;  %v741_v34 = vadd.f32 %v740_v36, %v739_v33  ;;  %v760_v50 = vsel %vm564_vm3, %v2167_v40, 0.0  ;;  %v711_v51 = vmul.f32 1.442695, %v686_v37  ;;  %v2177_v61 = vadd.f32 %v728_v43, %v727_v17  ;;  %v541_v36 = vpop.permute.xlu0 %540 }
 0x1e8   :  { %v737_v53 = vrot.slane %v736_v42, 1  ;;  %v749_v55 = vrot.slane %v748_v45, 2  ;;  %v761_v41 = vrot.slane %v760_v50, 4  ;;  %v753_v49 = vsel %vm564_vm3, %v2169_v47, 0.0 }
 0x1e9   :  { %v742_v56 = vrot.slane %v741_v34, 2  ;;  %v754_v57 = vrot.slane %v753_v49, 4  ;;  %1737 = vpow2.f32 %v711_v51  ;;  %v685_v48 = vsub.f32 %v2124_v46, %v627_v20 }
 0x1ea   :  { %v2175_v59 = vpop.eup %1733  ;;  %v738_v60 = vadd.f32 %v737_v53, %v736_v42  ;;  %v762_v63 = vadd.f32 %v761_v41, %v760_v50  ;;  %v2180_v1 = vadd.f32 %v749_v55, %v748_v45  ;;  %v647_v5 = vrot.slane %v646_v52, 1 }
 0x1eb   :  { %v755_v2 = vadd.f32 %v754_v57, %v753_v49  ;;  %v774_v4 = vsel %vm564_vm3, %v2175_v59, 0.0  ;;  %v743_v24 = vadd.f32 %v742_v56, %v741_v34  ;;  %v709_v30 = vmul.f32 1.442695, %v685_v48 }
 0x1ec   :  { %1739 = vrcp.f32 %v738_v60  ;;  %v763_v62 = vrot.slane %v762_v63, 2  ;;  %v775_v27 = vrot.slane %v774_v4, 4  ;;  %v648_v31 = vmax.f32 %v646_v52, %v647_v5 }
 0x1ed   :  { %v2184_v28 = vpop.eup %1735  ;;  %v756_v29 = vrot.slane %v755_v2, 2  ;;  %v656_v46 = vsel %vm564_vm3, %v2165_v39, -inf  ;;  %v730_v7 = vrot.slane %v2177_v61, 1  ;;  %v638_v10 = vrot.slane %v637_v44, 2 }
 0x1ee   :  { %v2189_v8 = vadd.f32 %v763_v62, %v762_v63  ;;  %v767_v9 = vsel %vm564_vm3, %v2184_v28, 0.0  ;;  %v751_v11 = vrot.slane %v2180_v1, 1  ;;  %1741 = vpow2.f32 %v709_v30 }
 0x1ef   :  { %v768_v15 = vrot.slane %v767_v9, 4  ;;  %v688_v16 = vsub.f32 %v2134_v58, %v648_v31  ;;  %v744_v12 = vrot.slane %v743_v24, 1  ;;  %v776_v17 = vadd.f32 %v775_v27, %v774_v4 }
 0x1f0   :  { %v639_v18 = vmax.f32 %v637_v44, %v638_v10  ;;  %v657_v19 = vrot.slane %v656_v46, 4  ;;  %v2195_v21 = vadd.f32 %v756_v29, %v755_v2  ;;  %v2198_v35 = vadd.f32 %v531_v23, %v2130_v54 }
 0x1f1   :  { %v769_v32 = vadd.f32 %v768_v15, %v767_v9  ;;  %v715_v33 = vmul.f32 1.442695, %v688_v16  ;;  %v765_v37 = vrot.slane %v2189_v8, 1  ;;  %v2202_v43 = vadd.f32 %v2139_v0, %v546_v14 }
 0x1f2   :  { %v640_v38 = vrot.slane %v639_v18, 1  ;;  %v658_v42 = vmax.f32 %v656_v46, %v657_v19  ;;  %v649_v20 = vsel %vm564_vm3, %v2198_v35, -inf  ;;  %v2209_v34 = vadd.f32 %v541_v36, %v2141_v6 }
 0x1f3   :  { %v2204_v58 = vpop.eup %1737  ;;  %v770_v45 = vrot.slane %v769_v32, 2  ;;  %1743 = vpow2.f32 %v715_v33  ;;  %v777_v54 = vrot.slane %v776_v17, 2  ;;  %v758_v53 = vrot.slane %v2195_v21, 1 }
 0x1f4   :  { %v788_v50 = vsel %vm564_vm3, %v2204_v58, 0.0  ;;  %v641_v51 = vmax.f32 %v639_v18, %v640_v38  ;;  %v659_v52 = vrot.slane %v658_v42, 2  ;;  %v650_v55 = vrot.slane %v649_v20, 4 }
 0x1f5   :  { %v789_v0 = vrot.slane %v788_v50, 4  ;;  %v670_v41 = vsel %vm564_vm3, %v2202_v43, -inf  ;;  %v663_v6 = vsel %vm564_vm3, %v2209_v34, -inf  ;;  %v771_v63 = vadd.f32 %v770_v45, %v769_v32 }
 0x1f6   :  { %v1740_v49 = vpop.eup %1739  ;;  %v687_v56 = vsub.f32 %v2145_v25, %v641_v51  ;;  %v660_v57 = vmax.f32 %v658_v42, %v659_v52  ;;  %v671_v44 = vrot.slane %v670_v41, 4  ;;  %v651_v2 = vmax.f32 %v649_v20, %v650_v55 }
 0x1f7   :  { %v2220_v60 = vmul.f32 %v1740_v49, %v2143_v22  ;;  %v790_v48 = vadd.f32 %v789_v0, %v788_v50  ;;  %v664_v62 = vrot.slane %v663_v6, 4  ;;  %v778_v25 = vadd.f32 %v777_v54, %v776_v17 }
 0x1f8   :  { %v713_v4 = vmul.f32 1.442695, %v687_v56  ;;  %v661_v5 = vrot.slane %v660_v57, 1  ;;  %v672_v23 = vmax.f32 %v670_v41, %v671_v44  ;;  %v2222_v27 = vpop.eup %1741  ;;  %v652_v29 = vrot.slane %v651_v2, 2 }
 0x1f9   :  { %870 = vst.msk [vmem:[%s2412_s7 + $0x8] sm:$0xff] %vm564_vm3, %v2220_v60  ;;  %v731_v22 = vadd.f32 %v730_v7, %v2177_v61  ;;  %v745_v30 = vadd.f32 %v744_v12, %v743_v24  ;;  %v781_v31 = vsel %vm564_vm3, %v2222_v27, 0.0  ;;  %v772_v10 = vrot.slane %v771_v63, 1 }
 0x1fa   :  { %1745 = vpow2.f32 %v713_v4  ;;  %v662_v46 = vmax.f32 %v660_v57, %v661_v5  ;;  %v673_v9 = vrot.slane %v672_v23, 2  ;;  %v782_v15 = vrot.slane %v781_v31, 4 }
 0x1fb   :  { %v653_v16 = vmax.f32 %v651_v2, %v652_v29  ;;  %v665_v18 = vmax.f32 %v663_v6, %v664_v62  ;;  %v791_v19 = vrot.slane %v790_v48, 2  ;;  %1747 = vrcp.f32 %v731_v22 }
 0x1fc   :  { %v690_v14 = vsub.f32 %v2165_v39, %v662_v46  ;;  %v674_v32 = vmax.f32 %v672_v23, %v673_v9  ;;  %v783_v33 = vadd.f32 %v782_v15, %v781_v31  ;;  %v752_v7 = vadd.f32 %v751_v11, %v2180_v1 }
 0x1fd   :  { %v2233_v17 = vpop.eup %1743  ;;  %v654_v61 = vrot.slane %v653_v16, 1  ;;  %v666_v24 = vrot.slane %v665_v18, 2  ;;  %1749 = vrcp.f32 %v745_v30  ;;  %v792_v54 = vadd.f32 %v791_v19, %v790_v48 }
 0x1fe   :  { %v802_v12 = vsel %vm564_vm3, %v2233_v17, 0.0  ;;  %v719_v36 = vmul.f32 1.442695, %v690_v14  ;;  %v675_v38 = vrot.slane %v674_v32, 1  ;;  %v784_v42 = vrot.slane %v783_v33, 2 }
 0x1ff   :  { %v803_v45 = vrot.slane %v802_v12, 4  ;;  %v655_v39 = vmax.f32 %v653_v16, %v654_v61  ;;  %v667_v20 = vmax.f32 %v665_v18, %v666_v24  ;;  %v759_v51 = vadd.f32 %v758_v53, %v2195_v21 }
 0x200   :  { %1751 = vpow2.f32 %v719_v36  ;;  %v676_v50 = vmax.f32 %v674_v32, %v675_v38  ;;  %v785_v52 = vadd.f32 %v784_v42, %v783_v33  ;;  %v779_v11 = vrot.slane %v778_v25, 1 }
 0x201   :  { %v804_v0 = vadd.f32 %v803_v45, %v802_v12  ;;  %v689_v55 = vsub.f32 %v2198_v35, %v655_v39  ;;  %v668_v1 = vrot.slane %v667_v20, 1  ;;  %1753 = vrcp.f32 %v752_v7 }
 0x202   :  { %v692_v41 = vsub.f32 %v2202_v43, %v676_v50  ;;  %v766_v49 = vadd.f32 %v765_v37, %v2189_v8  ;;  %v786_v56 = vrot.slane %v785_v52, 1  ;;  %v793_v21 = vrot.slane %v792_v54, 1 }
 0x203   :  { %v805_v57 = vrot.slane %v804_v0, 2  ;;  %v717_v44 = vmul.f32 1.442695, %v689_v55  ;;  %v669_v6 = vmax.f32 %v667_v20, %v668_v1  ;;  %1755 = vrcp.f32 %v759_v51 }
 0x204   :  { %v2246_v48 = vpop.eup %1745  ;;  %v723_v53 = vmul.f32 1.442695, %v692_v41  ;;  %v773_v2 = vadd.f32 %v772_v10, %v771_v63  ;;  %v780_v8 = vadd.f32 %v779_v11, %v778_v25  ;;  %v787_v37 = vadd.f32 %v786_v56, %v785_v52 }
 0x205   :  { %v806_v35 = vadd.f32 %v805_v57, %v804_v0  ;;  %v795_v4 = vsel %vm564_vm3, %v2246_v48, 0.0  ;;  %1757 = vpow2.f32 %v717_v44  ;;  %v691_v43 = vsub.f32 %v2209_v34, %v669_v6  ;;  %v1748_v5 = vpop.eup %1747 }
 0x206   :  { %v796_v23 = vrot.slane %v795_v4, 4  ;;  %1759 = vpow2.f32 %v723_v53  ;;  %v853_v22 = vmul.f32 %v1748_v5, %v2147_v26  ;;  %v794_v63 = vadd.f32 %v793_v21, %v792_v54 }
 0x207   :  { %v807_v62 = vrot.slane %v806_v35, 1  ;;  %v721_v29 = vmul.f32 1.442695, %v691_v43  ;;  %1761 = vrcp.f32 %v766_v49  ;;  %v1750_v30 = vpop.eup %1749 }
 0x208   :  { %v797_v31 = vadd.f32 %v796_v23, %v795_v4  ;;  %1763 = vrcp.f32 %v773_v2  ;;  %869 = vst.msk [vmem:[%s2412_s7] sm:$0xff] %vm564_vm3, %v853_v22  ;;  %1607 = vmatprep.mubr.msk.f32.mxu1 %vm564_vm3, %v853_v22  ;;  %v855_v34 = vmul.f32 %v1750_v30, %v2158_v3 }
 0x209   :  { %1765 = vpow2.f32 %v721_v29  ;;  %v808_v25 = vadd.f32 %v807_v62, %v806_v35  ;;  %1608 = vmatmul.mubr.msk.f32.vlgmr.msra.gmra.mrb[16].mxu1 %vm564_vm3, %v2220_v60 }
 0x20a   :  { %v2258_v46 = vpop.eup %1751  ;;  %v798_v9 = vrot.slane %v797_v31, 2  ;;  %1767 = vrcp.f32 %v780_v8  ;;  %871 = vst.msk [vmem:[%s2412_s7 + $0x10] sm:$0xff] %vm564_vm3, %v855_v34  ;;  %1610 = vmatprep.mubr.msk.f32.mxu1 %vm564_vm3, %v855_v34  ;;  %v1641_v34 = vpop.f32.mrb[16].mxu0 }
 0x20b   :  { %v816_v26 = vsel %vm564_vm3, %v2258_v46, 0.0  ;;  %1769 = vrcp.f32 %v787_v37  ;;  %v1754_v3 = vpop.eup %1753 }
 0x20c   :  { %v799_v10 = vadd.f32 %v798_v9, %v797_v31  ;;  %v817_v15 = vrot.slane %v816_v26, 4  ;;  %1771 = vrcp.f32 %v794_v63  ;;  %v856_v16 = vmul.f32 %v1754_v3, %v2154_v13 }
 0x20d   :  { %1773 = vrcp.f32 %v808_v25  ;;  %v1756_v60 = vpop.eup %1755  ;;  %v1153_v25 = vpop.f32.mrb[17].mxu0 }
 0x20e   :  { %v800_v18 = vrot.slane %v799_v10, 1  ;;  %v818_v19 = vadd.f32 %v817_v15, %v816_v26  ;;  %872 = vst.msk [vmem:[%s2412_s7 + $0x18] sm:$0xff] %vm564_vm3, %v856_v16  ;;  %1611 = vmatmul.mubr.msk.f32.gmra.mrb[18].mxu1 %vm564_vm3, %v856_v16  ;;  %v857_v32 = vmul.f32 %v1756_v60, %v2169_v47 }
 0x20f   :  { %v2270_v14 = vpop.eup %1757 }
 0x210   :  { %v2278_v33 = vpop.eup %1759  ;;  %v819_v61 = vrot.slane %v818_v19, 2  ;;  %v809_v13 = vsel %vm564_vm3, %v2270_v14, 0.0  ;;  %v801_v24 = vadd.f32 %v800_v18, %v799_v10  ;;  %873 = vst.msk [vmem:[%s2412_s7 + $0x20] sm:$0xff] %vm564_vm3, %v857_v32  ;;  %1613 = vmatprep.mubr.msk.f32.mxu1 %vm564_vm3, %v857_v32 }
 0x211   :  { %v1762_v7 = vpop.eup %1761  ;;  %v810_v12 = vrot.slane %v809_v13, 4  ;;  %v830_v36 = vsel %vm564_vm3, %v2278_v33, 0.0 }
 0x212   :  { %v1764_v47 = vpop.eup %1763  ;;  %v820_v38 = vadd.f32 %v819_v61, %v818_v19  ;;  %v831_v42 = vrot.slane %v830_v36, 4  ;;  %v858_v45 = vmul.f32 %v1762_v7, %v2167_v40  ;;  %1775 = vrcp.f32 %v801_v24 }
 0x213   :  { %v1766_v39 = vpop.eup %1765  ;;  %v811_v20 = vadd.f32 %v810_v12, %v809_v13  ;;  %v859_v54 = vmul.f32 %v1764_v47, %v2184_v28 }
 0x214   :  { %v1768_v50 = vpop.eup %1767  ;;  %v821_v51 = vrot.slane %v820_v38, 1  ;;  %v832_v52 = vadd.f32 %v831_v42, %v830_v36  ;;  %v823_v0 = vsel %vm564_vm3, %v1766_v39, 0.0  ;;  %874 = vst.msk [vmem:[%s2412_s7 + $0x28] sm:$0xff] %vm564_vm3, %v858_v45  ;;  %1614 = vmatmul.mubr.msk.f32.gmra.mrb[20].mxu1 %vm564_vm3, %v858_v45 }
 0x215   :  { %v1770_v55 = vpop.eup %1769  ;;  %v812_v1 = vrot.slane %v811_v20, 2  ;;  %v824_v40 = vrot.slane %v823_v0, 4  ;;  %875 = vst.msk [vmem:[%s2412_s7 + $0x30] sm:$0xff] %vm564_vm3, %v859_v54  ;;  %1616 = vmatprep.mubr.msk.f32.mxu1 %vm564_vm3, %v859_v54  ;;  %v860_v28 = vmul.f32 %v1768_v50, %v2175_v59 }
 0x216   :  { %v1772_v11 = vpop.eup %1771  ;;  %v833_v41 = vrot.slane %v832_v52, 2  ;;  %v861_v49 = vmul.f32 %v1770_v55, %v2222_v27  ;;  %v822_v56 = vadd.f32 %v821_v51, %v820_v38 }
 0x217   :  { %v1774_v57 = vpop.eup %1773  ;;  %v813_v44 = vadd.f32 %v812_v1, %v811_v20  ;;  %v825_v6 = vadd.f32 %v824_v40, %v823_v0  ;;  %876 = vst.msk [vmem:[%s2412_s7 + $0x38] sm:$0xff] %vm564_vm3, %v860_v28  ;;  %v862_v21 = vmul.f32 %v1772_v11, %v2204_v58 }
 0x218   :  { %v834_v53 = vadd.f32 %v833_v41, %v832_v52  ;;  %1617 = vmatmul.mubr.msk.f32.gmra.mrb[22].mxu1 %vm564_vm3, %v860_v28  ;;  %877 = vst.msk [vmem:[%s2412_s7 + $0x40] sm:$0xff] %vm564_vm3, %v861_v49  ;;  %v864_v59 = vmul.f32 %v1774_v57, %v2233_v17  ;;  %1777 = vrcp.f32 %v822_v56 }
 0x219   :  { %v814_v27 = vrot.slane %v813_v44, 1  ;;  %v826_v2 = vrot.slane %v825_v6, 2  ;;  %1619 = vmatprep.mubr.msk.f32.mxu1 %vm564_vm3, %v861_v49  ;;  %878 = vst.msk [vmem:[%s2412_s7 + $0x48] sm:$0xff] %vm564_vm3, %v862_v21 }
 0x21a   :  { %v835_v58 = vrot.slane %v834_v53, 1  ;;  %880 = vst.msk [vmem:[%s2412_s7 + $0x58] sm:$0xff] %vm564_vm3, %v864_v59 }
 0x21b   :  { %v827_v35 = vadd.f32 %v826_v2, %v825_v6  ;;  %v815_v4 = vadd.f32 %v814_v27, %v813_v44 }
 0x21c   :  { %v1776_v43 = vpop.eup %1775  ;;  %1620 = vmatmul.mubr.msk.f32.gmra.mrb[24].mxu1 %vm564_vm3, %v862_v21  ;;  %v836_v17 = vadd.f32 %v835_v58, %v834_v53 }
 0x21d   :  { %v828_v5 = vrot.slane %v827_v35, 1  ;;  %v863_v23 = vmul.f32 %v1776_v43, %v2246_v48  ;;  %1779 = vrcp.f32 %v815_v4 }
 0x21e   :  { %1781 = vrcp.f32 %v836_v17 }
 0x21f   :  { %879 = vst.msk [vmem:[%s2412_s7 + $0x50] sm:$0xff] %vm564_vm3, %v863_v23  ;;  %1622 = vmatprep.mubr.msk.f32.mxu1 %vm564_vm3, %v863_v23  ;;  %v829_v8 = vadd.f32 %v828_v5, %v827_v35 }
 0x220   :  { %1623 = vmatmul.mubr.msk.f32.gmra.mrb[26].mxu1 %vm564_vm3, %v864_v59 }
 0x221   :  { %1783 = vrcp.f32 %v829_v8 }
 0x222   :  { %v1778_v37 = vpop.eup %1777 }
 0x223   :  { %v866_v62 = vmul.f32 %v1778_v37, %v2258_v46  ;;  %v1644_v46 = vpop.f32.mrb[18].mxu0 }
 0x224   :  { %v1163_v9 = vpop.f32.mrb[19].mxu0 }
 0x225   :  { %882 = vst.msk [vmem:[%s2412_s7 + $0x68] sm:$0xff] %vm564_vm3, %v866_v62  ;;  %v1647_v26 = vpop.f32.mrb[20].mxu0 }
 0x226   :  { %v1173_v3 = vpop.f32.mrb[21].mxu0 }
 0x227   :  { %v1780_v48 = vpop.eup %1779  ;;  %v1650_v10 = vpop.f32.mrb[22].mxu0 }
 0x228   :  { %v1782_v29 = vpop.eup %1781  ;;  %v865_v22 = vmul.f32 %v1780_v48, %v2270_v14  ;;  %v1183_v15 = vpop.f32.mrb[23].mxu0 }
 0x229   :  { %v868_v30 = vmul.f32 %v1782_v29, %v2278_v33  ;;  %v2355_v16 = vpop.f32.mrb[24].mxu0 }
 0x22a   :  { %881 = vst.msk [vmem:[%s2412_s7 + $0x60] sm:$0xff] %vm564_vm3, %v865_v22  ;;  %1625 = vmatprep.mubr.msk.f32.mxu1 %vm564_vm3, %v865_v22  ;;  %v2357_v60 = vpop.f32.mrb[25].mxu0 }
 0x22b   :  { %v1784_v31 = vpop.eup %1783  ;;  %1626 = vmatmul.mubr.msk.f32.gmra.mrb[28].mxu1 %vm564_vm3, %v866_v62  ;;  %884 = vst.msk [vmem:[%s2412_s7 + $0x78] sm:$0xff] %vm564_vm3, %v868_v30  ;;  %v2359_v18 = vpop.f32.mrb[26].mxu0 }
 0x22c   :  { %v867_v63 = vmul.f32 %v1784_v31, %v1766_v39  ;;  %v2361_v19 = vpop.f32.mrb[27].mxu0 }
 0x22d   :  { %v2363_v14 = vpop.f32.mrb[28].mxu0 }
 0x22e   :  { %883 = vst.msk [vmem:[%s2412_s7 + $0x70] sm:$0xff] %vm564_vm3, %v867_v63  ;;  %1628 = vmatprep.mubr.msk.f32.mxu1 %vm564_vm3, %v867_v63  ;;  %v2365_v32 = vpop.f32.mrb[29].mxu0  ;;  %s1810_s7 = smov [#allocation2]  }
 0x22f   :  { %1629 = vmatmul.mubr.msk.f32.gmra.mrb[30].mxu1 %vm564_vm3, %v868_v30  ;;  %v2367_v33 = vpop.f32.mrb[30].mxu0  ;;  %s1390_s11 = sshll.u32 %s1810_s7, 4  ;;  %s1391_s11 = int_to_ptr.vmem [resolvable:$true] %s1390_s11 }
 0x230   :  { %v2369_v61 = vpop.f32.mrb[31].mxu0  ;;  %s1785_s12 = scalar_lea.vmem %s1391_s11, 256  ;;  %p1790_p1 = scmp.lt.s32.totalorder %s1391_s11, %s1391_s11 }
 0x231   :  { %p1786_p0 = scmp.ne.s32.totalorder %s1391_s11, %s1785_s12  ;;  %p1791_p2 = scmp.lt.s32.totalorder %s1785_s12, %s1785_s12 }
 0x233   :  { %p1792_p3 = por %p1791_p2, %p1790_p1 }
 0x235   :  { %p1793_p4 = pnand %p1792_p3, %p1786_p0 }
 0x2dc   :  { %v1609_v13 = vpop.f32.mrb[16].mxu1 }
 0x2dd   :  { %v1233_v24 = vmul.f32 %v1641_v34, %v1609_v13  ;;  %v1004_v7 = vpop.f32.mrb[17].mxu1 }
 0x2de   :  { %v1232_v12 = vmul.f32 %v1153_v25, %v1004_v7 }
 0x2df   :  { %v1254_v36 = vrot.slane %v1233_v24, 4 }
 0x2e0   :  { %v1248_v47 = vrot.slane %v1232_v12, 4 }
 0x2e1   :  { %v1255_v38 = vadd.f32 %v1254_v36, %v1233_v24  ;;  %v1612_v42 = vpop.f32.mrb[18].mxu1 }
 0x2e2   :  { %v1249_v45 = vadd.f32 %v1248_v47, %v1232_v12  ;;  %v1235_v39 = vmul.f32 %v1644_v46, %v1612_v42  ;;  %v1014_v20 = vpop.f32.mrb[19].mxu1 }
 0x2e3   :  { %v1256_v54 = vrot.slane %v1255_v38, 2  ;;  %v1234_v50 = vmul.f32 %v1163_v9, %v1014_v20 }
 0x2e4   :  { %v1250_v51 = vrot.slane %v1249_v45, 2  ;;  %v1266_v52 = vrot.slane %v1235_v39, 4 }
 0x2e5   :  { %v1257_v0 = vadd.f32 %v1256_v54, %v1255_v38  ;;  %v1260_v55 = vrot.slane %v1234_v50, 4 }
 0x2e6   :  { %v1251_v1 = vadd.f32 %v1250_v51, %v1249_v45  ;;  %v1267_v40 = vadd.f32 %v1266_v52, %v1235_v39 }
 0x2e7   :  { %v1615_v28 = vpop.f32.mrb[20].mxu1  ;;  %v1258_v11 = vrot.slane %v1257_v0, 1  ;;  %v1261_v41 = vadd.f32 %v1260_v55, %v1234_v50 }
 0x2e8   :  { %v1237_v49 = vmul.f32 %v1647_v26, %v1615_v28  ;;  %v1024_v56 = vpop.f32.mrb[21].mxu1  ;;  %v1252_v57 = vrot.slane %v1251_v1, 1  ;;  %v1268_v44 = vrot.slane %v1267_v40, 2 }
 0x2e9   :  { %v1236_v6 = vmul.f32 %v1173_v3, %v1024_v56  ;;  %v1259_v21 = vadd.f32 %v1258_v11, %v1257_v0  ;;  %v1262_v53 = vrot.slane %v1261_v41, 2 }
 0x2ea   :  { %v1278_v59 = vrot.slane %v1237_v49, 4  ;;  %v1253_v27 = vadd.f32 %v1252_v57, %v1251_v1  ;;  %v1269_v2 = vadd.f32 %v1268_v44, %v1267_v40 }
 0x2eb   :  { %v1272_v58 = vrot.slane %v1236_v6, 4  ;;  %v1618_v35 = vpop.f32.mrb[22].mxu1  ;;  %v1263_v4 = vadd.f32 %v1262_v53, %v1261_v41 }
 0x2ec   :  { %v1279_v43 = vadd.f32 %v1278_v59, %v1237_v49  ;;  %v1239_v17 = vmul.f32 %v1650_v10, %v1618_v35  ;;  %v1034_v5 = vpop.f32.mrb[23].mxu1  ;;  %v1361_v23 = vsel %vm1360_vm4, %v1259_v21, %v1253_v27  ;;  %v1270_v8 = vrot.slane %v1269_v2, 1 }
 0x2ed   :  { %v1273_v37 = vadd.f32 %v1272_v58, %v1236_v6  ;;  %v1238_v62 = vmul.f32 %v1183_v15, %v1034_v5  ;;  %v1264_v48 = vrot.slane %v1263_v4, 1 }
 0x2ee   :  { %v1280_v29 = vrot.slane %v1279_v43, 2  ;;  %v1290_v22 = vrot.slane %v1239_v17, 4  ;;  %v1271_v3 = vadd.f32 %v1270_v8, %v1269_v2 }
 0x2ef   :  { %v1274_v30 = vrot.slane %v1273_v37, 2  ;;  %v1284_v31 = vrot.slane %v1238_v62, 4  ;;  %v1621_v63 = vpop.f32.mrb[24].mxu1  ;;  %v1265_v34 = vadd.f32 %v1264_v48, %v1263_v4 }
 0x2f0   :  { %v1281_v25 = vadd.f32 %v1280_v29, %v1279_v43  ;;  %v1291_v46 = vadd.f32 %v1290_v22, %v1239_v17  ;;  %v1241_v9 = vmul.f32 %v2355_v16, %v1621_v63  ;;  %v1044_v26 = vpop.f32.mrb[25].mxu1 }
 0x2f1   :  { %v1275_v10 = vadd.f32 %v1274_v30, %v1273_v37  ;;  %v1285_v13 = vadd.f32 %v1284_v31, %v1238_v62  ;;  %v1240_v15 = vmul.f32 %v2357_v60, %v1044_v26  ;;  %v1363_v24 = vsel %vm1362_vm5, %v1265_v34, %v1361_v23 }
 0x2f2   :  { %v1282_v7 = vrot.slane %v1281_v25, 1  ;;  %v1292_v12 = vrot.slane %v1291_v46, 2  ;;  %v1302_v36 = vrot.slane %v1241_v9, 4  ;;  %v1365_v38 = vsel %vm1364_vm6, %v1271_v3, %v1363_v24 }
 0x2f3   :  { %v1276_v47 = vrot.slane %v1275_v10, 1  ;;  %v1286_v42 = vrot.slane %v1285_v13, 2  ;;  %v1296_v45 = vrot.slane %v1240_v15, 4  ;;  %v1624_v39 = vpop.f32.mrb[26].mxu1 }
 0x2f4   :  { %v1293_v20 = vadd.f32 %v1292_v12, %v1291_v46  ;;  %v1303_v54 = vadd.f32 %v1302_v36, %v1241_v9  ;;  %v1243_v16 = vmul.f32 %v2359_v18, %v1624_v39  ;;  %v1054_v50 = vpop.f32.mrb[27].mxu1  ;;  %v1283_v55 = vadd.f32 %v1282_v7, %v1281_v25 }
 0x2f5   :  { %v1277_v51 = vadd.f32 %v1276_v47, %v1275_v10  ;;  %v1287_v52 = vadd.f32 %v1286_v42, %v1285_v13  ;;  %v1297_v60 = vadd.f32 %v1296_v45, %v1240_v15  ;;  %v1242_v0 = vmul.f32 %v2361_v19, %v1054_v50 }
 0x2f6   :  { %v1294_v1 = vrot.slane %v1293_v20, 1  ;;  %v1304_v40 = vrot.slane %v1303_v54, 2  ;;  %v1314_v28 = vrot.slane %v1243_v16, 4 }
 0x2f7   :  { %v1367_v11 = vsel %vm1366_vm7, %v1277_v51, %v1365_v38  ;;  %v1288_v41 = vrot.slane %v1287_v52, 1  ;;  %v1298_v49 = vrot.slane %v1297_v60, 2  ;;  %v1308_v56 = vrot.slane %v1242_v0, 4 }
 0x2f8   :  { %v1305_v57 = vadd.f32 %v1304_v40, %v1303_v54  ;;  %v1315_v44 = vadd.f32 %v1314_v28, %v1243_v16  ;;  %v1369_v18 = vsel %vm1368_vm8, %v1283_v55, %v1367_v11  ;;  %v1295_v59 = vadd.f32 %v1294_v1, %v1293_v20 }
 0x2f9   :  { %v1289_v6 = vadd.f32 %v1288_v41, %v1287_v52  ;;  %v1299_v21 = vadd.f32 %v1298_v49, %v1297_v60  ;;  %v1309_v53 = vadd.f32 %v1308_v56, %v1242_v0 }
 0x2fa   :  { %v1306_v19 = vrot.slane %v1305_v57, 1  ;;  %v1316_v27 = vrot.slane %v1315_v44, 2 }
 0x2fb   :  { %v1300_v2 = vrot.slane %v1299_v21, 1  ;;  %v1310_v58 = vrot.slane %v1309_v53, 2  ;;  %v1371_v35 = vsel %vm1370_vm9, %v1289_v6, %v1369_v18 }
 0x2fc   :  { %v1307_v4 = vadd.f32 %v1306_v19, %v1305_v57  ;;  %v1317_v43 = vadd.f32 %v1316_v27, %v1315_v44  ;;  %v1373_v17 = vsel %vm1372_vm10, %v1295_v59, %v1371_v35 }
 0x2fd   :  { %v1301_v5 = vadd.f32 %v1300_v2, %v1299_v21  ;;  %v1311_v23 = vadd.f32 %v1310_v58, %v1309_v53  ;;  %1383 = vst [vmem:[#allocation2] sm:$0xff] %v1373_v17 }
 0x2fe   :  { %v1318_v8 = vrot.slane %v1317_v43, 1  ;;  %v1627_v37 = vpop.f32.mrb[28].mxu1 }
 0x2ff   :  { %v1374_v62 = vsel %vm1360_vm4, %v1307_v4, %v1301_v5  ;;  %v1312_v48 = vrot.slane %v1311_v23, 1  ;;  %v1245_v29 = vmul.f32 %v2363_v14, %v1627_v37  ;;  %v1064_v22 = vpop.f32.mrb[29].mxu1 }
 0x300   :  { %v1244_v30 = vmul.f32 %v2365_v32, %v1064_v22  ;;  %v1319_v34 = vadd.f32 %v1318_v8, %v1317_v43 }
 0x301   :  { %v1313_v31 = vadd.f32 %v1312_v48, %v1311_v23  ;;  %v1326_v63 = vrot.slane %v1245_v29, 4 }
 0x302   :  { %v1320_v25 = vrot.slane %v1244_v30, 4  ;;  %v1630_v46 = vpop.f32.mrb[30].mxu1 }
 0x303   :  { %v1375_v9 = vsel %vm1362_vm5, %v1313_v31, %v1374_v62  ;;  %v1327_v26 = vadd.f32 %v1326_v63, %v1245_v29  ;;  %v1247_v3 = vmul.f32 %v2367_v33, %v1630_v46  ;;  %v1074_v10 = vpop.f32.mrb[31].mxu1 }
 0x304   :  { %v1321_v13 = vadd.f32 %v1320_v25, %v1244_v30  ;;  %v1376_v15 = vsel %vm1364_vm6, %v1319_v34, %v1375_v9  ;;  %v1246_v24 = vmul.f32 %v2369_v61, %v1074_v10 }
 0x305   :  { %v1328_v14 = vrot.slane %v1327_v26, 2  ;;  %v1338_v7 = vrot.slane %v1247_v3, 4 }
 0x306   :  { %v1322_v12 = vrot.slane %v1321_v13, 2  ;;  %v1332_v32 = vrot.slane %v1246_v24, 4 }
 0x307   :  { %v1329_v36 = vadd.f32 %v1328_v14, %v1327_v26  ;;  %v1339_v47 = vadd.f32 %v1338_v7, %v1247_v3 }
 0x308   :  { %v1323_v38 = vadd.f32 %v1322_v12, %v1321_v13  ;;  %v1333_v42 = vadd.f32 %v1332_v32, %v1246_v24 }
 0x309   :  { %v1330_v45 = vrot.slane %v1329_v36, 1  ;;  %v1340_v39 = vrot.slane %v1339_v47, 2 }
 0x30a   :  { %v1324_v20 = vrot.slane %v1323_v38, 1  ;;  %v1334_v54 = vrot.slane %v1333_v42, 2 }
 0x30b   :  { %v1341_v16 = vadd.f32 %v1340_v39, %v1339_v47  ;;  %v1331_v51 = vadd.f32 %v1330_v45, %v1329_v36 }
 0x30c   :  { %v1325_v33 = vadd.f32 %v1324_v20, %v1323_v38  ;;  %v1335_v50 = vadd.f32 %v1334_v54, %v1333_v42 }
 0x30d   :  { %v1342_v52 = vrot.slane %v1341_v16, 1 }
 0x30e   :  { %v1377_v60 = vsel %vm1366_vm7, %v1325_v33, %v1376_v15  ;;  %v1336_v61 = vrot.slane %v1335_v50, 1 }
 0x30f   :  { %v1378_v0 = vsel %vm1368_vm8, %v1331_v51, %v1377_v60  ;;  %v1343_v1 = vadd.f32 %v1342_v52, %v1341_v16 }
 0x310   :  { %v1337_v55 = vadd.f32 %v1336_v61, %v1335_v50 }
 0x312   :  { %v1379_v40 = vsel %vm1370_vm9, %v1337_v55, %v1378_v0 }
 0x313   :  { %v1380_v28 = vsel %vm1372_vm10, %v1343_v1, %v1379_v40 }
 0x314   :  { %1384 = vst [vmem:[#allocation2 + $0x8] sm:$0xff] %v1380_v28 }
 0x315   :  { %1796 = shalt.err (!%p1793_p4)
}
 0x316   :  { %s1797_s2 = scalar_lea.hbm %s2411_s6, 256 }
 0x317   :  { %p1798_p5 = scmp.ne.s32.totalorder %s2411_s6, %s1797_s2  ;;  %p1801_p6 = scmp.lt.u32.totalorder %s1797_s2, %s2411_s6 }
 0x319   :  { %p1803_p7 = pnand %p1801_p6, %p1798_p5 }
 0x31b   :  { %1806 = shalt.err (!%p1803_p7)
}
 0x31c   :  { %s1811_s19 = smov 128   ;;  %s1812_s20 = smov 8  }
 0x31d   :  { %1396 = dma.vmem_to_hbm [thread:$0]  %s1391_s11, 256, %s2411_s6, [#allocation3], %s1811_s19, %s1811_s19, %s1812_s20  }
 0x31e   :  { %1807 = dma.done.wait [#allocation3], 256  }
 0x31f   :  { %1808 = vsyncadd [#allocation3], 4294967040 }
 0x320   :  { %1404 = vsyncpa [#allocation3], 1 }

</bundles_post_ra>
